<compile_context>
chip_gen: v6e
topology: v6e:2x2x1
jax: 0.10.0
libtpu: 0.0.40
codegen_flags: <defaults>
</compile_context>

<pallas_src>
import math

import jax
import jax.numpy as jnp
from jax.experimental import pallas as pl
from jax.experimental.pallas import tpu as pltpu


def _calibrator_kernel(x_ref, w_ref, o_ref):
    # x_ref: [TILE_N, H] (native dtype), w_ref: [1, H] (same dtype), o_ref: [TILE_N, 1]
    prod = x_ref[...] * w_ref[...]                      # VPU broadcast-multiply, native dtype
    logits = jnp.sum(prod, axis=-1, keepdims=True,      # f32 accumulation on the lane reduce
                     dtype=jnp.float32)
    o_ref[...] = jax.nn.sigmoid(logits).astype(o_ref.dtype)


def _tile_budget():
    """Generation-aware (tile_bytes, vmem_limit_bytes)."""
    vmem_cap = 64 * 1024 * 1024  # conservative default (v7x-sized VMEM)
    try:
        info = pltpu.get_tpu_info()
        vmem_cap = int(getattr(info, "vmem_capacity_bytes", vmem_cap))
    except Exception:
        pass
    if vmem_cap >= 96 * 1024 * 1024:
        # v5e / v6e: 128 MiB VMEM per TensorCore -> big tiles, generous limit.
        return 32 * 1024 * 1024, 96 * 1024 * 1024
    # v7x: 64 MiB VMEM per TensorCore -> 16 MiB tiles (32 MiB double-buffered).
    return 16 * 1024 * 1024, 48 * 1024 * 1024


def calibrator_forward(hidden_states, weight, *, tile_bytes=None, vmem_limit_bytes=None):
    """Pallas equivalent of Calibrator.forward.

    hidden_states: [..., H] array.
    weight:        [1, H] array (PyTorch Linear weight layout).
    Returns (sigmoid(hidden_states @ weight.T), None) with shape [..., 1].
    """
    *lead, hidden = hidden_states.shape
    n = math.prod(lead) if lead else 1
    dtype = hidden_states.dtype
    itemsize = jnp.dtype(dtype).itemsize

    auto_tile, auto_vmem = _tile_budget()
    if tile_bytes is None:
        tile_bytes = auto_tile
    if vmem_limit_bytes is None:
        vmem_limit_bytes = auto_vmem

    # Sublane alignment: 8 for 4-byte, 16 for 2-byte, 32 for 1-byte dtypes.
    sublane = max(8, 32 // itemsize)

    # Largest sublane-aligned tile under the per-tile VMEM budget.
    row_bytes = hidden * itemsize
    tile_n = max(sublane, ((tile_bytes // row_bytes) // sublane) * sublane)

    # Keep at least two grid steps (when there is enough work) so the
    # "parallel" grid axis can shard across both TensorCores on megacore parts.
    n_ceil = ((n + sublane - 1) // sublane) * sublane
    if n_ceil > 2 * sublane:
        half = (((n_ceil + 1) // 2) + sublane - 1) // sublane * sublane
        tile_n = min(tile_n, half)
    else:
        tile_n = min(tile_n, n_ceil)

    num_tiles = (n + tile_n - 1) // tile_n  # ragged last block handled by Pallas
    grid = (num_tiles,)

    x2d = hidden_states.reshape(n, hidden)
    # Reshape/cast the weight once in the wrapper (1 x H) so no per-grid-step
    # cast/broadcast work is re-emitted inside the loop.
    w_row = weight.reshape(1, hidden).astype(dtype)

    n_work = num_tiles * tile_n  # rows actually streamed, including ragged tail
    out2d = pl.pallas_call(
        _calibrator_kernel,
        out_shape=jax.ShapeDtypeStruct((n, 1), dtype),
        grid=grid,
        in_specs=[
            pl.BlockSpec((tile_n, hidden), lambda i: (i, 0)),   # streamed activation rows
            pl.BlockSpec((1, hidden), lambda i: (0, 0)),        # resident weight row
        ],
        out_specs=pl.BlockSpec((tile_n, 1), lambda i: (i, 0)),
        compiler_params=pltpu.CompilerParams(
            dimension_semantics=("parallel",),
            vmem_limit_bytes=vmem_limit_bytes,
        ),
        cost_estimate=pl.CostEstimate(
            flops=2 * n_work * hidden,
            transcendentals=n_work,
            bytes_accessed=n_work * hidden * itemsize
            + n * itemsize
            + hidden * itemsize,
        ),
    )(x2d, w_row)

    return out2d.reshape(*lead, 1), None


if __name__ == "__main__":
    # Small shapes consistent with the module: batch=2, seq=8, hidden=32.
    batch, seq, hidden = 2, 8, 32

    key = jax.random.PRNGKey(0)
    k_x, k_w = jax.random.split(key)

    hidden_states = jax.random.normal(k_x, (batch, seq, hidden), dtype=jnp.float32)
    # Deterministic init of Linear(hidden, 1, bias=False) weight, shape (1, hidden).
    bound = 1.0 / (hidden ** 0.5)
    weight = jax.random.uniform(
        k_w, (1, hidden), dtype=jnp.float32, minval=-bound, maxval=bound
    )

    out, aux = calibrator_forward(hidden_states, weight)
    out = jax.block_until_ready(out)

    # Reference check in plain JAX.
    ref = jax.nn.sigmoid(hidden_states @ weight.T)
    assert out.shape == (batch, seq, 1)
    assert aux is None
    assert jnp.allclose(out, ref, atol=1e-5, rtol=1e-5)

    print("KERNEL_OK")
</pallas_src>

<mosaic_0001>
module attributes {stable_mosaic.version = 11 : i64} {
  func.func @_calibrator_kernel(%arg0: i32, %arg1: memref<16x32xf32, #tpu.memory_space<vmem>>, %arg2: memref<1x32xf32, #tpu.memory_space<vmem>>, %arg3: memref<16x1xf32, #tpu.memory_space<vmem>>) attributes {dimension_semantics = [#tpu.dimension_semantics<parallel>], iteration_bounds = array<i64: 1>, scalar_prefetch = 0 : i64, scratch_operands = 0 : i64, tpu.core_type = #tpu.core_type<tc>, window_params = [{transform_indices = @transform_0, window_bounds = array<i64: 16, 32>}, {pipeline_mode = #tpu.pipeline_mode<synchronous>, transform_indices = @transform_1, window_bounds = array<i64: 1, 32>}, {transform_indices = @transform_2, window_bounds = array<i64: 16, 1>}]} {
    %c0 = arith.constant 0 : index
    %c0_0 = arith.constant 0 : index
    %0 = vector.load %arg1[%c0, %c0_0] : memref<16x32xf32, #tpu.memory_space<vmem>>, vector<16x32xf32>
    %c0_1 = arith.constant 0 : index
    %c0_2 = arith.constant 0 : index
    %1 = vector.load %arg2[%c0_1, %c0_2] : memref<1x32xf32, #tpu.memory_space<vmem>>, vector<1x32xf32>
    %2 = vector.broadcast %1 : vector<1x32xf32> to vector<16x32xf32>
    %3 = arith.mulf %0, %2 : vector<16x32xf32>
    %cst = arith.constant dense<0.000000e+00> : vector<16xf32>
    %4 = vector.multi_reduction <add>, %3, %cst [1] : vector<16x32xf32> to vector<16xf32>
    %5 = vector.shape_cast %4 : vector<16xf32> to vector<16x1xf32>
    %6 = arith.negf %5 : vector<16x1xf32>
    %7 = math.exp %6 : vector<16x1xf32>
    %cst_3 = arith.constant 1.000000e+00 : f32
    %8 = vector.broadcast %cst_3 : f32 to vector<16x1xf32>
    %9 = arith.addf %8, %7 : vector<16x1xf32>
    %10 = arith.divf %8, %9 : vector<16x1xf32>
    %c0_4 = arith.constant 0 : index
    %c0_5 = arith.constant 0 : index
    %11 = vector.load %arg3[%c0_4, %c0_5] : memref<16x1xf32, #tpu.memory_space<vmem>>, vector<16x1xf32>
    tpu.vector_store %arg3[%c0_4, %c0_5], %10 {strides = array<i32>} : memref<16x1xf32, #tpu.memory_space<vmem>>, vector<16x1xf32>,
    return
  }
  func.func @transform_0(%arg0: i32) -> (i32, i32) {
    %c0_i32 = arith.constant 0 : i32
    %c0_i32_0 = arith.constant 0 : i32
    return %arg0, %c0_i32 : i32, i32
  }
  func.func @transform_1(%arg0: i32) -> (i32, i32) {
    %c0_i32 = arith.constant 0 : i32
    %c0_i32_0 = arith.constant 0 : i32
    %c0_i32_1 = arith.constant 0 : i32
    return %c0_i32, %c0_i32_0 : i32, i32
  }
  func.func @transform_2(%arg0: i32) -> (i32, i32) {
    %c0_i32 = arith.constant 0 : i32
    %c0_i32_0 = arith.constant 0 : i32
    return %arg0, %c0_i32 : i32, i32
  }
}

</mosaic_0001>

<bundles_post_ra>
// kernel: tpu_custom_call.1
= control target key start
LH: loop header
LB: loop body
LE: loop exit
PB: predicated region body
PF: predicated region fallthrough
CT: control target
= control target key end

     0   :  { %7 = vsyncpa [#allocation3], 0  ;;  %s99_s9 = smov [#allocation2]   ;;  %s129_s0 = inlined_call_operand.hbm [shape: f32[16,32], index: 0, kind: input, shape index: {}]   ;;  %s130_s1 = inlined_call_operand.vmem [shape: f32[1,32], index: 1, kind: input, shape index: {}]   ;;  %s131_s2 = inlined_call_operand.vmem [shape: f32[16,1], index: 2, kind: output, shape index: {}]  }
   0x1   :  { %s13_s10 = sshll.u32 %s99_s9, 4  ;;  %s14_s10 = int_to_ptr.vmem [resolvable:$true] %s13_s10 }
   0x2   :  { %s85_s11 = scalar_lea.vmem %s14_s10, 256  ;;  %p90_p1 = scmp.lt.s32.totalorder %s14_s10, %s14_s10 }
   0x3   :  { %p86_p0 = scmp.ne.s32.totalorder %s14_s10, %s85_s11  ;;  %p91_p2 = scmp.lt.s32.totalorder %s85_s11, %s85_s11 }
   0x5   :  { %p92_p3 = por %p91_p2, %p90_p1 }
   0x7   :  { %p93_p4 = pnand %p92_p3, %p86_p0 }
   0x9   :  { %96 = shalt.err (!%p93_p4)
}
   0xa   :  { %s100_s12 = smov 128   ;;  %s101_s13 = smov 8  }
   0xb   :  { %19 = dma.hbm_to_vmem [thread:$0]  %s129_s0, 256, %s14_s10, [#allocation3], %s100_s12, %s100_s12, %s101_s13  }
   0xc   :  { %97 = dma.done.wait [#allocation3], 256  }
   0xd   :  { %98 = vsyncadd [#allocation3], 4294967040  ;;  %v25_v0 = vld [vmem:[#allocation2] sm:$0xff]  ;;  %vm36_vm0 = vcmask 261120   ;;  %v26_v2 = vld [vmem:[#allocation2 + $0x8] sm:$0xff]  ;;  %vm55_vm1 = vcmask 7168  }
   0xe   :  { %v63_v1 = vld [vmem:[%s130_s1] ss:$0 sm:$0xff] }
   0xf   :  { %v34_v3 = vmul.f32 %v63_v1, %v25_v0  ;;  %v35_v4 = vmul.f32 %v63_v1, %v26_v2 }
  0x11   :  { %v37_v5 = vsel %vm36_vm0, %v34_v3, 0.0  ;;  %v40_v6 = vsel %vm36_vm0, %v35_v4, 0.0 }
  0x12   :  { %38 = vadd.xlane.f32.xlu0 %v37_v5 }
  0x16   :  { %41 = vadd.xlane.f32.xlu0 %v40_v6 }
  0x9b   :  { %v39_v7 = vpop.xlane.xlu0 %38 }
  0x9c   :  { %v64_v8 = vmul.f32 -1.442695, %v39_v7 }
  0x9e   :  { %69 = vpow2.f32 %v64_v8 }
  0x9f   :  { %v42_v9 = vpop.xlane.xlu0 %41 }
  0xa0   :  { %v65_v10 = vmul.f32 -1.442695, %v42_v9 }
  0xa2   :  { %71 = vpow2.f32 %v65_v10 }
  0xab   :  { %v70_v11 = vpop.eup %69 }
  0xac   :  { %v49_v12 = vadd.f32 1.0, %v70_v11 }
  0xae   :  { %73 = vrcp.f32 %v49_v12 }
  0xaf   :  { %v72_v13 = vpop.eup %71 }
  0xb0   :  { %v50_v14 = vadd.f32 1.0, %v72_v13 }
  0xb2   :  { %75 = vrcp.f32 %v50_v14 }
  0xbb   :  { %v74_v15 = vpop.eup %73 }
  0xbc   :  { %56 = vst.msk [vmem:[%s131_s2] sm:$0xff] %vm55_vm1, %v74_v15 }
  0xbf   :  { %v76_v16 = vpop.eup %75 }
  0xc0   :  { %57 = vst.msk [vmem:[%s131_s2 + $0x8] sm:$0xff] %vm55_vm1, %v76_v16 }
  0xc1   :  { %62 = vsyncpa [#allocation3], 1 }

</bundles_post_ra>
